<compile_context>
chip_gen: v6e
topology: v6e:2x2x1
jax: 0.10.0
libtpu: 0.0.40
codegen_flags: <defaults>
</compile_context>

<pallas_src>
import functools

import jax
import jax.numpy as jnp
from jax.experimental import pallas as pl
from jax.experimental.pallas import tpu as pltpu


# ---------------------------------------------------------------------------
# In-kernel helper (traced inside the Pallas kernel body)
# ---------------------------------------------------------------------------
def _attention(qkv, off, d):
    """Softmax attention on bf16 q/k/v slices of a fused qkv buffer.

    1/sqrt(d) is already folded into the Q weights/bias at init.
    """
    q = qkv[:, off:off + d]
    k = qkv[:, off + d:off + 2 * d]
    v = qkv[:, off + 2 * d:off + 3 * d]
    scores = jax.lax.dot_general(                       # q @ k^T
        q, k, dimension_numbers=(((1,), (1,)), ((), ())),
        preferred_element_type=jnp.float32)             # (N, N) f32
    scores = scores - jnp.max(scores, axis=-1, keepdims=True)   # softmax dim=1
    e = jnp.exp(scores)
    attn = e / jnp.sum(e, axis=-1, keepdims=True)
    return jnp.dot(attn.astype(jnp.bfloat16), v,
                   preferred_element_type=jnp.float32)  # (N, d) f32


# ---------------------------------------------------------------------------
# Fused SWEEM kernel
# ---------------------------------------------------------------------------
def sweem_kernel(x_ref, event_ref, din_ref, dmod_ref, dcross_ref, dhead_ref,
                 mod_wqkv, mod_bqkv, mod_wd, mod_bd,
                 cross_wqkv, cross_bqkv, cross_wd, cross_bd,
                 w1c_ref, w1e_ref, b1_ref, w2_ref, b2_ref,
                 o_ref, *, dims):
    total = sum(dims)

    # merged input Dropout(p=0.8) over the lane-concatenated modalities
    x = x_ref[...] * din_ref[...]                                  # (N, T) f32

    # --- three modality SelfAttResNet blocks: block-diag fused QKV + dense ---
    qkv = (jnp.dot(x.astype(jnp.bfloat16), mod_wqkv[...],
                   preferred_element_type=jnp.float32) + mod_bqkv[...])
    qkv = qkv.astype(jnp.bfloat16)                                 # single pack
    weighted = []
    off = 0
    for d in dims:
        weighted.append(_attention(qkv, off, d))
        off += 3 * d
    cat2 = jnp.concatenate([x] + weighted, axis=1).astype(jnp.bfloat16)  # (N,2T)
    mod_out = jnp.maximum(
        jnp.dot(cat2, mod_wd[...], preferred_element_type=jnp.float32)
        + mod_bd[...], 0.0)                                        # ReLU
    cat = mod_out * dmod_ref[...]          # merged post-attention Dropout(0.5)

    # --- cross attention over the concatenated modalities --------------------
    qkv_c = (jnp.dot(cat.astype(jnp.bfloat16), cross_wqkv[...],
                     preferred_element_type=jnp.float32) + cross_bqkv[...])
    qkv_c = qkv_c.astype(jnp.bfloat16)
    w_c = _attention(qkv_c, 0, total)
    cat2c = jnp.concatenate([cat, w_c], axis=1).astype(jnp.bfloat16)     # (N,2T)
    cross_out = jnp.maximum(
        jnp.dot(cat2c, cross_wd[...], preferred_element_type=jnp.float32)
        + cross_bd[...], 0.0)
    cat = cross_out * dcross_ref[...]                              # Dropout(0.5)

    # --- head: dense1([cat, event]) -> Dropout(0.5) -> ReLU -> dense2 -> sig -
    h = (jnp.dot(cat.astype(jnp.bfloat16), w1c_ref[...],
                 preferred_element_type=jnp.float32)
         + event_ref[...] * w1e_ref[...]       # (N,1)*(1,H) = event column
         + b1_ref[...])
    h = jnp.maximum(h * dhead_ref[...], 0.0)                       # drop, ReLU
    logit = (jnp.dot(h.astype(jnp.bfloat16), w2_ref[...],
                     preferred_element_type=jnp.float32) + b2_ref[...])
    o_ref[...] = jax.nn.sigmoid(logit)


# ---------------------------------------------------------------------------
# Wrapper: single pallas_call, no grid, whole-array VMEM residency
# ---------------------------------------------------------------------------
def sweem_forward(event, rna, scna, methy, masks, params):
    n = event.shape[0]
    dims = (rna.shape[1], scna.shape[1], methy.shape[1])
    x_cat = jnp.concatenate([rna, scna, methy], axis=1)            # (N, T) f32
    flat = (x_cat, event, *masks,
            *params["mod"], *params["cross"], *params["head"])
    return pl.pallas_call(
        functools.partial(sweem_kernel, dims=dims),
        in_specs=[pl.BlockSpec(memory_space=pltpu.MemorySpace.VMEM)] * len(flat),
        out_specs=pl.BlockSpec(memory_space=pltpu.MemorySpace.VMEM),
        out_shape=jax.ShapeDtypeStruct((n, 1), jnp.float32),
    )(*flat)


# ---------------------------------------------------------------------------
# Dropout masks (pre-scaled: 0 or 1/keep).  Caller varies `key` per step;
# for inference pass all-ones masks.
# ---------------------------------------------------------------------------
def make_dropout_masks(key, n, total, hidden):
    k1, k2, k3, k4 = jax.random.split(key, 4)

    def m(k, shape, keep):
        return (jax.random.bernoulli(k, keep, shape).astype(jnp.float32)
                * (1.0 / keep))

    return (m(k1, (n, total), 0.2),    # input Dropout(p=0.8), merged
            m(k2, (n, total), 0.5),    # post-self-att Dropout(p=0.5), merged
            m(k3, (n, total), 0.5),    # post-cross-att Dropout(p=0.5)
            m(k4, (n, hidden), 0.5))   # head Dropout(p=0.5)


# ---------------------------------------------------------------------------
# Parameter init (deterministic, PyTorch-Linear-like uniform init).
# Weights are pre-transposed to (in, out); per-modality blocks are packed
# into block-diagonal fused matrices; Q columns are pre-scaled by 1/sqrt(D);
# matmul weights cast to bf16 once here; biases stay f32.
# ---------------------------------------------------------------------------
def init_linear(key, in_dim, out_dim):
    k1, k2 = jax.random.split(key)
    bound = 1.0 / (in_dim ** 0.5)
    w = jax.random.uniform(k1, (in_dim, out_dim), jnp.float32, -bound, bound)
    b = jax.random.uniform(k2, (1, out_dim), jnp.float32, -bound, bound)
    return w, b


def init_self_att(key, d):
    kq, kk, kv, kd = jax.random.split(key, 4)
    wq, bq = init_linear(kq, d, d)
    wk, bk = init_linear(kk, d, d)
    wv, bv = init_linear(kv, d, d)
    wd, bd = init_linear(kd, 2 * d, d)
    scale = 1.0 / (d ** 0.5)                      # fold 1/sqrt(D) into Q
    wqkv = jnp.concatenate([wq * scale, wk, wv], axis=1)   # (D, 3D)
    bqkv = jnp.concatenate([bq * scale, bk, bv], axis=1)   # (1, 3D)
    return wqkv, bqkv, wd, bd


def fuse_modalities(blocks, dims):
    """Pack per-modality (wqkv, bqkv, wd, bd) into block-diagonal fused mats."""
    total = sum(dims)
    wqkv = jnp.zeros((total, 3 * total), jnp.float32)
    wd = jnp.zeros((2 * total, total), jnp.float32)
    bqkv_parts, bd_parts = [], []
    r = c = o = 0
    for (wq, bq, wdn, bdn), d in zip(blocks, dims):
        wqkv = wqkv.at[r:r + d, c:c + 3 * d].set(wq)
        wd = wd.at[r:r + d, o:o + d].set(wdn[:d])                    # x part
        wd = wd.at[total + r:total + r + d, o:o + d].set(wdn[d:])    # weighted
        bqkv_parts.append(bq)
        bd_parts.append(bdn)
        r += d
        c += 3 * d
        o += d
    return (wqkv.astype(jnp.bfloat16),
            jnp.concatenate(bqkv_parts, axis=1),
            wd.astype(jnp.bfloat16),
            jnp.concatenate(bd_parts, axis=1))


def init_sweem(key, rna_dim, scna_dim, methy_dim, hidden_dim):
    total = rna_dim + scna_dim + methy_dim
    k1, k2, k3, k4, k5, k6 = jax.random.split(key, 6)
    mod = fuse_modalities(
        [init_self_att(k1, rna_dim),
         init_self_att(k2, scna_dim),
         init_self_att(k3, methy_dim)],
        (rna_dim, scna_dim, methy_dim))
    cwqkv, cbqkv, cwd, cbd = init_self_att(k4, total)
    cross = (cwqkv.astype(jnp.bfloat16), cbqkv, cwd.astype(jnp.bfloat16), cbd)
    w1, b1 = init_linear(k5, total + 1, hidden_dim)
    w2, b2 = init_linear(k6, hidden_dim, 1)
    head = (w1[:total].astype(jnp.bfloat16),   # dense1 on cat   (T, H) bf16
            w1[total:],                        # dense1 on event (1, H) f32
            b1,                                # (1, H)
            w2.astype(jnp.bfloat16),           # (H, 1)
            b2)                                # (1, 1)
    return {"mod": mod, "cross": cross, "head": head}


# ---------------------------------------------------------------------------
if __name__ == "__main__":
    N = 16                                # multiple of 8; 16 fills bf16 sublanes
    RNA_DIM, SCNA_DIM, METHY_DIM, HIDDEN = 32, 16, 16, 32
    TOTAL = RNA_DIM + SCNA_DIM + METHY_DIM

    root = jax.random.PRNGKey(0)
    k_param, k_rna, k_scna, k_methy, k_event, k_drop = jax.random.split(root, 6)

    params = init_sweem(k_param, RNA_DIM, SCNA_DIM, METHY_DIM, HIDDEN)

    rna = jax.random.normal(k_rna, (N, RNA_DIM), jnp.float32)
    scna = jax.random.normal(k_scna, (N, SCNA_DIM), jnp.float32)
    methy = jax.random.normal(k_methy, (N, METHY_DIM), jnp.float32)
    event = jax.random.bernoulli(k_event, 0.5, (N, 1)).astype(jnp.float32)
    masks = make_dropout_masks(k_drop, N, TOTAL, HIDDEN)   # vary per train step

    out = jax.block_until_ready(
        sweem_forward(event, rna, scna, methy, masks, params))

    assert out.shape == (N, 1)
    assert bool(jnp.all(jnp.isfinite(out)))
    assert bool(jnp.all((out >= 0.0) & (out <= 1.0)))
    print("KERNEL_OK")
</pallas_src>

<mosaic_0001>
module attributes {stable_mosaic.version = 11 : i64} {
  func.func @sweem_kernel(%arg0: memref<16x64xf32, #tpu.memory_space<vmem>>, %arg1: memref<16x1xf32, #tpu.memory_space<vmem>>, %arg2: memref<16x64xf32, #tpu.memory_space<vmem>>, %arg3: memref<16x64xf32, #tpu.memory_space<vmem>>, %arg4: memref<16x64xf32, #tpu.memory_space<vmem>>, %arg5: memref<16x32xf32, #tpu.memory_space<vmem>>, %arg6: memref<64x192xbf16, #tpu.memory_space<vmem>>, %arg7: memref<1x192xf32, #tpu.memory_space<vmem>>, %arg8: memref<128x64xbf16, #tpu.memory_space<vmem>>, %arg9: memref<1x64xf32, #tpu.memory_space<vmem>>, %arg10: memref<64x192xbf16, #tpu.memory_space<vmem>>, %arg11: memref<1x192xf32, #tpu.memory_space<vmem>>, %arg12: memref<128x64xbf16, #tpu.memory_space<vmem>>, %arg13: memref<1x64xf32, #tpu.memory_space<vmem>>, %arg14: memref<64x32xbf16, #tpu.memory_space<vmem>>, %arg15: memref<1x32xf32, #tpu.memory_space<vmem>>, %arg16: memref<1x32xf32, #tpu.memory_space<vmem>>, %arg17: memref<32x1xbf16, #tpu.memory_space<vmem>>, %arg18: memref<1x1xf32, #tpu.memory_space<vmem>>, %arg19: memref<16x1xf32, #tpu.memory_space<vmem>>) attributes {dimension_semantics = [], scalar_prefetch = 0 : i64, scratch_operands = 0 : i64, tpu.core_type = #tpu.core_type<tc>} {
    %c0 = arith.constant 0 : index
    %c0_0 = arith.constant 0 : index
    %0 = vector.load %arg0[%c0, %c0_0] : memref<16x64xf32, #tpu.memory_space<vmem>>, vector<16x64xf32>
    %c0_1 = arith.constant 0 : index
    %c0_2 = arith.constant 0 : index
    %1 = vector.load %arg2[%c0_1, %c0_2] : memref<16x64xf32, #tpu.memory_space<vmem>>, vector<16x64xf32>
    %2 = arith.mulf %0, %1 : vector<16x64xf32>
    %3 = arith.truncf %2 : vector<16x64xf32> to vector<16x64xbf16>
    %c0_3 = arith.constant 0 : index
    %c0_4 = arith.constant 0 : index
    %4 = vector.load %arg6[%c0_3, %c0_4] : memref<64x192xbf16, #tpu.memory_space<vmem>>, vector<64x192xbf16>
    %cst = arith.constant dense<0.000000e+00> : vector<16x192xf32>
    %5 = tpu.matmul %3, %4, %cst {dimension_numbers = #tpu.dot_dimension_numbers<[1], [0], [0], [1], [0, 0, 1, 1], [], []>} : vector<16x64xbf16>, vector<64x192xbf16>, vector<16x192xf32> -> vector<16x192xf32>
    %c0_5 = arith.constant 0 : index
    %c0_6 = arith.constant 0 : index
    %6 = vector.load %arg7[%c0_5, %c0_6] : memref<1x192xf32, #tpu.memory_space<vmem>>, vector<1x192xf32>
    %7 = vector.broadcast %6 : vector<1x192xf32> to vector<16x192xf32>
    %8 = arith.addf %5, %7 : vector<16x192xf32>
    %9 = arith.truncf %8 : vector<16x192xf32> to vector<16x192xbf16>
    %10 = vector.extract_strided_slice %9 {offsets = [0, 0], sizes = [16, 32], strides = [1, 1]} : vector<16x192xbf16> to vector<16x32xbf16>
    %11 = vector.extract_strided_slice %9 {offsets = [0, 32], sizes = [16, 32], strides = [1, 1]} : vector<16x192xbf16> to vector<16x32xbf16>
    %12 = vector.extract_strided_slice %9 {offsets = [0, 64], sizes = [16, 32], strides = [1, 1]} : vector<16x192xbf16> to vector<16x32xbf16>
    %cst_7 = arith.constant dense<0.000000e+00> : vector<16x16xf32>
    %13 = tpu.matmul %10, %11, %cst_7 {dimension_numbers = #tpu.dot_dimension_numbers<[1], [1], [0], [0], [0, 0, 1, 0], [], []>} : vector<16x32xbf16>, vector<16x32xbf16>, vector<16x16xf32> -> vector<16x16xf32>
    %cst_8 = arith.constant dense<0xFF800000> : vector<16xf32>
    %14 = vector.multi_reduction <maximumf>, %13, %cst_8 [1] : vector<16x16xf32> to vector<16xf32>
    %15 = vector.shape_cast %14 : vector<16xf32> to vector<16x1xf32>
    %16 = vector.broadcast %15 : vector<16x1xf32> to vector<16x16xf32>
    %17 = arith.subf %13, %16 : vector<16x16xf32>
    %18 = math.exp %17 : vector<16x16xf32>
    %cst_9 = arith.constant dense<0.000000e+00> : vector<16xf32>
    %19 = vector.multi_reduction <add>, %18, %cst_9 [1] : vector<16x16xf32> to vector<16xf32>
    %20 = vector.shape_cast %19 : vector<16xf32> to vector<16x1xf32>
    %21 = vector.broadcast %20 : vector<16x1xf32> to vector<16x16xf32>
    %22 = arith.divf %18, %21 : vector<16x16xf32>
    %23 = arith.truncf %22 : vector<16x16xf32> to vector<16x16xbf16>
    %cst_10 = arith.constant dense<0.000000e+00> : vector<16x32xf32>
    %24 = tpu.matmul %23, %12, %cst_10 {dimension_numbers = #tpu.dot_dimension_numbers<[1], [0], [0], [1], [0, 0, 1, 1], [], []>} : vector<16x16xbf16>, vector<16x32xbf16>, vector<16x32xf32> -> vector<16x32xf32>
    %25 = vector.extract_strided_slice %9 {offsets = [0, 96], sizes = [16, 16], strides = [1, 1]} : vector<16x192xbf16> to vector<16x16xbf16>
    %26 = vector.extract_strided_slice %9 {offsets = [0, 112], sizes = [16, 16], strides = [1, 1]} : vector<16x192xbf16> to vector<16x16xbf16>
    %27 = vector.extract_strided_slice %9 {offsets = [0, 128], sizes = [16, 16], strides = [1, 1]} : vector<16x192xbf16> to vector<16x16xbf16>
    %cst_11 = arith.constant dense<0.000000e+00> : vector<16x16xf32>
    %28 = tpu.matmul %25, %26, %cst_11 {dimension_numbers = #tpu.dot_dimension_numbers<[1], [1], [0], [0], [0, 0, 1, 0], [], []>} : vector<16x16xbf16>, vector<16x16xbf16>, vector<16x16xf32> -> vector<16x16xf32>
    %cst_12 = arith.constant dense<0xFF800000> : vector<16xf32>
    %29 = vector.multi_reduction <maximumf>, %28, %cst_12 [1] : vector<16x16xf32> to vector<16xf32>
    %30 = vector.shape_cast %29 : vector<16xf32> to vector<16x1xf32>
    %31 = vector.broadcast %30 : vector<16x1xf32> to vector<16x16xf32>
    %32 = arith.subf %28, %31 : vector<16x16xf32>
    %33 = math.exp %32 : vector<16x16xf32>
    %cst_13 = arith.constant dense<0.000000e+00> : vector<16xf32>
    %34 = vector.multi_reduction <add>, %33, %cst_13 [1] : vector<16x16xf32> to vector<16xf32>
    %35 = vector.shape_cast %34 : vector<16xf32> to vector<16x1xf32>
    %36 = vector.broadcast %35 : vector<16x1xf32> to vector<16x16xf32>
    %37 = arith.divf %33, %36 : vector<16x16xf32>
    %38 = arith.truncf %37 : vector<16x16xf32> to vector<16x16xbf16>
    %cst_14 = arith.constant dense<0.000000e+00> : vector<16x16xf32>
    %39 = tpu.matmul %38, %27, %cst_14 {dimension_numbers = #tpu.dot_dimension_numbers<[1], [0], [0], [1], [0, 0, 1, 1], [], []>} : vector<16x16xbf16>, vector<16x16xbf16>, vector<16x16xf32> -> vector<16x16xf32>
    %40 = vector.extract_strided_slice %9 {offsets = [0, 144], sizes = [16, 16], strides = [1, 1]} : vector<16x192xbf16> to vector<16x16xbf16>
    %41 = vector.extract_strided_slice %9 {offsets = [0, 160], sizes = [16, 16], strides = [1, 1]} : vector<16x192xbf16> to vector<16x16xbf16>
    %42 = vector.extract_strided_slice %9 {offsets = [0, 176], sizes = [16, 16], strides = [1, 1]} : vector<16x192xbf16> to vector<16x16xbf16>
    %cst_15 = arith.constant dense<0.000000e+00> : vector<16x16xf32>
    %43 = tpu.matmul %40, %41, %cst_15 {dimension_numbers = #tpu.dot_dimension_numbers<[1], [1], [0], [0], [0, 0, 1, 0], [], []>} : vector<16x16xbf16>, vector<16x16xbf16>, vector<16x16xf32> -> vector<16x16xf32>
    %cst_16 = arith.constant dense<0xFF800000> : vector<16xf32>
    %44 = vector.multi_reduction <maximumf>, %43, %cst_16 [1] : vector<16x16xf32> to vector<16xf32>
    %45 = vector.shape_cast %44 : vector<16xf32> to vector<16x1xf32>
    %46 = vector.broadcast %45 : vector<16x1xf32> to vector<16x16xf32>
    %47 = arith.subf %43, %46 : vector<16x16xf32>
    %48 = math.exp %47 : vector<16x16xf32>
    %cst_17 = arith.constant dense<0.000000e+00> : vector<16xf32>
    %49 = vector.multi_reduction <add>, %48, %cst_17 [1] : vector<16x16xf32> to vector<16xf32>
    %50 = vector.shape_cast %49 : vector<16xf32> to vector<16x1xf32>
    %51 = vector.broadcast %50 : vector<16x1xf32> to vector<16x16xf32>
    %52 = arith.divf %48, %51 : vector<16x16xf32>
    %53 = arith.truncf %52 : vector<16x16xf32> to vector<16x16xbf16>
    %cst_18 = arith.constant dense<0.000000e+00> : vector<16x16xf32>
    %54 = tpu.matmul %53, %42, %cst_18 {dimension_numbers = #tpu.dot_dimension_numbers<[1], [0], [0], [1], [0, 0, 1, 1], [], []>} : vector<16x16xbf16>, vector<16x16xbf16>, vector<16x16xf32> -> vector<16x16xf32>
    %55 = tpu.concatenate %2, %24, %39, %54 in 1 : vector<16x64xf32>, vector<16x32xf32>, vector<16x16xf32>, vector<16x16xf32> -> vector<16x128xf32>
    %56 = arith.truncf %55 : vector<16x128xf32> to vector<16x128xbf16>
    %c0_19 = arith.constant 0 : index
    %c0_20 = arith.constant 0 : index
    %57 = vector.load %arg8[%c0_19, %c0_20] : memref<128x64xbf16, #tpu.memory_space<vmem>>, vector<128x64xbf16>
    %cst_21 = arith.constant dense<0.000000e+00> : vector<16x64xf32>
    %58 = tpu.matmul %56, %57, %cst_21 {dimension_numbers = #tpu.dot_dimension_numbers<[1], [0], [0], [1], [0, 0, 1, 1], [], []>} : vector<16x128xbf16>, vector<128x64xbf16>, vector<16x64xf32> -> vector<16x64xf32>
    %c0_22 = arith.constant 0 : index
    %c0_23 = arith.constant 0 : index
    %59 = vector.load %arg9[%c0_22, %c0_23] : memref<1x64xf32, #tpu.memory_space<vmem>>, vector<1x64xf32>
    %60 = vector.broadcast %59 : vector<1x64xf32> to vector<16x64xf32>
    %61 = arith.addf %58, %60 : vector<16x64xf32>
    %cst_24 = arith.constant 0.000000e+00 : f32
    %62 = vector.broadcast %cst_24 : f32 to vector<16x64xf32>
    %63 = arith.maximumf %61, %62 : vector<16x64xf32>
    %c0_25 = arith.constant 0 : index
    %c0_26 = arith.constant 0 : index
    %64 = vector.load %arg3[%c0_25, %c0_26] : memref<16x64xf32, #tpu.memory_space<vmem>>, vector<16x64xf32>
    %65 = arith.mulf %63, %64 : vector<16x64xf32>
    %66 = arith.truncf %65 : vector<16x64xf32> to vector<16x64xbf16>
    %c0_27 = arith.constant 0 : index
    %c0_28 = arith.constant 0 : index
    %67 = vector.load %arg10[%c0_27, %c0_28] : memref<64x192xbf16, #tpu.memory_space<vmem>>, vector<64x192xbf16>
    %cst_29 = arith.constant dense<0.000000e+00> : vector<16x192xf32>
    %68 = tpu.matmul %66, %67, %cst_29 {dimension_numbers = #tpu.dot_dimension_numbers<[1], [0], [0], [1], [0, 0, 1, 1], [], []>} : vector<16x64xbf16>, vector<64x192xbf16>, vector<16x192xf32> -> vector<16x192xf32>
    %c0_30 = arith.constant 0 : index
    %c0_31 = arith.constant 0 : index
    %69 = vector.load %arg11[%c0_30, %c0_31] : memref<1x192xf32, #tpu.memory_space<vmem>>, vector<1x192xf32>
    %70 = vector.broadcast %69 : vector<1x192xf32> to vector<16x192xf32>
    %71 = arith.addf %68, %70 : vector<16x192xf32>
    %72 = arith.truncf %71 : vector<16x192xf32> to vector<16x192xbf16>
    %73 = vector.extract_strided_slice %72 {offsets = [0, 0], sizes = [16, 64], strides = [1, 1]} : vector<16x192xbf16> to vector<16x64xbf16>
    %74 = vector.extract_strided_slice %72 {offsets = [0, 64], sizes = [16, 64], strides = [1, 1]} : vector<16x192xbf16> to vector<16x64xbf16>
    %75 = vector.extract_strided_slice %72 {offsets = [0, 128], sizes = [16, 64], strides = [1, 1]} : vector<16x192xbf16> to vector<16x64xbf16>
    %cst_32 = arith.constant dense<0.000000e+00> : vector<16x16xf32>
    %76 = tpu.matmul %73, %74, %cst_32 {dimension_numbers = #tpu.dot_dimension_numbers<[1], [1], [0], [0], [0, 0, 1, 0], [], []>} : vector<16x64xbf16>, vector<16x64xbf16>, vector<16x16xf32> -> vector<16x16xf32>
    %cst_33 = arith.constant dense<0xFF800000> : vector<16xf32>
    %77 = vector.multi_reduction <maximumf>, %76, %cst_33 [1] : vector<16x16xf32> to vector<16xf32>
    %78 = vector.shape_cast %77 : vector<16xf32> to vector<16x1xf32>
    %79 = vector.broadcast %78 : vector<16x1xf32> to vector<16x16xf32>
    %80 = arith.subf %76, %79 : vector<16x16xf32>
    %81 = math.exp %80 : vector<16x16xf32>
    %cst_34 = arith.constant dense<0.000000e+00> : vector<16xf32>
    %82 = vector.multi_reduction <add>, %81, %cst_34 [1] : vector<16x16xf32> to vector<16xf32>
    %83 = vector.shape_cast %82 : vector<16xf32> to vector<16x1xf32>
    %84 = vector.broadcast %83 : vector<16x1xf32> to vector<16x16xf32>
    %85 = arith.divf %81, %84 : vector<16x16xf32>
    %86 = arith.truncf %85 : vector<16x16xf32> to vector<16x16xbf16>
    %cst_35 = arith.constant dense<0.000000e+00> : vector<16x64xf32>
    %87 = tpu.matmul %86, %75, %cst_35 {dimension_numbers = #tpu.dot_dimension_numbers<[1], [0], [0], [1], [0, 0, 1, 1], [], []>} : vector<16x16xbf16>, vector<16x64xbf16>, vector<16x64xf32> -> vector<16x64xf32>
    %88 = tpu.concatenate %65, %87 in 1 : vector<16x64xf32>, vector<16x64xf32> -> vector<16x128xf32>
    %89 = arith.truncf %88 : vector<16x128xf32> to vector<16x128xbf16>
    %c0_36 = arith.constant 0 : index
    %c0_37 = arith.constant 0 : index
    %90 = vector.load %arg12[%c0_36, %c0_37] : memref<128x64xbf16, #tpu.memory_space<vmem>>, vector<128x64xbf16>
    %cst_38 = arith.constant dense<0.000000e+00> : vector<16x64xf32>
    %91 = tpu.matmul %89, %90, %cst_38 {dimension_numbers = #tpu.dot_dimension_numbers<[1], [0], [0], [1], [0, 0, 1, 1], [], []>} : vector<16x128xbf16>, vector<128x64xbf16>, vector<16x64xf32> -> vector<16x64xf32>
    %c0_39 = arith.constant 0 : index
    %c0_40 = arith.constant 0 : index
    %92 = vector.load %arg13[%c0_39, %c0_40] : memref<1x64xf32, #tpu.memory_space<vmem>>, vector<1x64xf32>
    %93 = vector.broadcast %92 : vector<1x64xf32> to vector<16x64xf32>
    %94 = arith.addf %91, %93 : vector<16x64xf32>
    %cst_41 = arith.constant 0.000000e+00 : f32
    %95 = vector.broadcast %cst_41 : f32 to vector<16x64xf32>
    %96 = arith.maximumf %94, %95 : vector<16x64xf32>
    %c0_42 = arith.constant 0 : index
    %c0_43 = arith.constant 0 : index
    %97 = vector.load %arg4[%c0_42, %c0_43] : memref<16x64xf32, #tpu.memory_space<vmem>>, vector<16x64xf32>
    %98 = arith.mulf %96, %97 : vector<16x64xf32>
    %99 = arith.truncf %98 : vector<16x64xf32> to vector<16x64xbf16>
    %c0_44 = arith.constant 0 : index
    %c0_45 = arith.constant 0 : index
    %100 = vector.load %arg14[%c0_44, %c0_45] : memref<64x32xbf16, #tpu.memory_space<vmem>>, vector<64x32xbf16>
    %cst_46 = arith.constant dense<0.000000e+00> : vector<16x32xf32>
    %101 = tpu.matmul %99, %100, %cst_46 {dimension_numbers = #tpu.dot_dimension_numbers<[1], [0], [0], [1], [0, 0, 1, 1], [], []>} : vector<16x64xbf16>, vector<64x32xbf16>, vector<16x32xf32> -> vector<16x32xf32>
    %c0_47 = arith.constant 0 : index
    %c0_48 = arith.constant 0 : index
    %102 = vector.load %arg1[%c0_47, %c0_48] : memref<16x1xf32, #tpu.memory_space<vmem>>, vector<16x1xf32>
    %c0_49 = arith.constant 0 : index
    %c0_50 = arith.constant 0 : index
    %103 = vector.load %arg15[%c0_49, %c0_50] : memref<1x32xf32, #tpu.memory_space<vmem>>, vector<1x32xf32>
    %104 = vector.broadcast %102 : vector<16x1xf32> to vector<16x32xf32>
    %105 = vector.broadcast %103 : vector<1x32xf32> to vector<16x32xf32>
    %106 = arith.mulf %104, %105 : vector<16x32xf32>
    %107 = arith.addf %101, %106 : vector<16x32xf32>
    %c0_51 = arith.constant 0 : index
    %c0_52 = arith.constant 0 : index
    %108 = vector.load %arg16[%c0_51, %c0_52] : memref<1x32xf32, #tpu.memory_space<vmem>>, vector<1x32xf32>
    %109 = vector.broadcast %108 : vector<1x32xf32> to vector<16x32xf32>
    %110 = arith.addf %107, %109 : vector<16x32xf32>
    %c0_53 = arith.constant 0 : index
    %c0_54 = arith.constant 0 : index
    %111 = vector.load %arg5[%c0_53, %c0_54] : memref<16x32xf32, #tpu.memory_space<vmem>>, vector<16x32xf32>
    %112 = arith.mulf %110, %111 : vector<16x32xf32>
    %cst_55 = arith.constant 0.000000e+00 : f32
    %113 = vector.broadcast %cst_55 : f32 to vector<16x32xf32>
    %114 = arith.maximumf %112, %113 : vector<16x32xf32>
    %115 = arith.truncf %114 : vector<16x32xf32> to vector<16x32xbf16>
    %c0_56 = arith.constant 0 : index
    %c0_57 = arith.constant 0 : index
    %116 = vector.load %arg17[%c0_56, %c0_57] : memref<32x1xbf16, #tpu.memory_space<vmem>>, vector<32x1xbf16>
    %cst_58 = arith.constant dense<0.000000e+00> : vector<16x1xf32>
    %117 = tpu.matmul %115, %116, %cst_58 {dimension_numbers = #tpu.dot_dimension_numbers<[1], [0], [0], [1], [0, 0, 1, 1], [], []>} : vector<16x32xbf16>, vector<32x1xbf16>, vector<16x1xf32> -> vector<16x1xf32>
    %c0_59 = arith.constant 0 : index
    %c0_60 = arith.constant 0 : index
    %118 = vector.load %arg18[%c0_59, %c0_60] : memref<1x1xf32, #tpu.memory_space<vmem>>, vector<1x1xf32>
    %119 = vector.broadcast %118 : vector<1x1xf32> to vector<16x1xf32>
    %120 = arith.addf %117, %119 : vector<16x1xf32>
    %121 = arith.negf %120 : vector<16x1xf32>
    %122 = math.exp %121 : vector<16x1xf32>
    %cst_61 = arith.constant 1.000000e+00 : f32
    %123 = vector.broadcast %cst_61 : f32 to vector<16x1xf32>
    %124 = arith.addf %123, %122 : vector<16x1xf32>
    %125 = arith.divf %123, %124 : vector<16x1xf32>
    %c0_62 = arith.constant 0 : index
    %c0_63 = arith.constant 0 : index
    %126 = vector.load %arg19[%c0_62, %c0_63] : memref<16x1xf32, #tpu.memory_space<vmem>>, vector<16x1xf32>
    tpu.vector_store %arg19[%c0_62, %c0_63], %125 {strides = array<i32>} : memref<16x1xf32, #tpu.memory_space<vmem>>, vector<16x1xf32>,
    return
  }
}

</mosaic_0001>

<bundles_post_ra>
// kernel: tpu_custom_call.1
= control target key start
LH: loop header
LB: loop body
LE: loop exit
PB: predicated region body
PF: predicated region fallthrough
CT: control target
= control target key end

     0   :  { %s2043_s0 = inlined_call_operand.vmem [shape: f32[16,64], index: 0, kind: input, shape index: {}]   ;;  %s2044_s1 = inlined_call_operand.vmem [shape: f32[16,1], index: 1, kind: input, shape index: {}]   ;;  %s2045_s2 = inlined_call_operand.vmem [shape: f32[16,64], index: 2, kind: input, shape index: {}]   ;;  %s2046_s3 = inlined_call_operand.vmem [shape: f32[16,64], index: 3, kind: input, shape index: {}]   ;;  %s2047_s4 = inlined_call_operand.vmem [shape: f32[16,64], index: 4, kind: input, shape index: {}]   ;;  %s2048_s5 = inlined_call_operand.hbm [shape: f32[16,32], index: 5, kind: input, shape index: {}]   ;;  %s2049_s6 = inlined_call_operand.vmem [shape: bf16[64,192], index: 6, kind: input, shape index: {}]   ;;  %s2050_s7 = inlined_call_operand.vmem [shape: f32[1,192], index: 7, kind: input, shape index: {}]   ;;  %s2051_s8 = inlined_call_operand.vmem [shape: bf16[128,64], index: 8, kind: input, shape index: {}]   ;;  %s2052_s9 = inlined_call_operand.vmem [shape: f32[1,64], index: 9, kind: input, shape index: {}]   ;;  %s2053_s10 = inlined_call_operand.vmem [shape: bf16[64,192], index: 10, kind: input, shape index: {}]   ;;  %s2054_s11 = inlined_call_operand.vmem [shape: f32[1,192], index: 11, kind: input, shape index: {}]   ;;  %s2055_s12 = inlined_call_operand.vmem [shape: bf16[128,64], index: 12, kind: input, shape index: {}]   ;;  %s2056_s13 = inlined_call_operand.vmem [shape: f32[1,64], index: 13, kind: input, shape index: {}]   ;;  %s2057_s14 = inlined_call_operand.vmem [shape: bf16[64,32], index: 14, kind: input, shape index: {}]   ;;  %s2058_s15 = inlined_call_operand.vmem [shape: f32[1,32], index: 15, kind: input, shape index: {}]   ;;  %s2059_s16 = inlined_call_operand.vmem [shape: f32[1,32], index: 16, kind: input, shape index: {}]   ;;  %s2060_s17 = inlined_call_operand.vmem [shape: bf16[32,1], index: 17, kind: input, shape index: {}]   ;;  %s2061_s18 = inlined_call_operand.<no memory space> [shape: f32[1,1], index: 18, kind: input, shape index: {}]   ;;  %s2062_s19 = inlined_call_operand.vmem [shape: f32[16,1], index: 19, kind: output, shape index: {}]  }
   0x1   :  { %2067 = sst [smem:[#allocation6_spill]] %s2043_s0  ;;  %v24_v0 = vstv %s2061_s18 }
   0x2   :  { %2068 = sst [smem:[#allocation7_spill]] %s2044_s1  ;;  %25 = vst [vmem:[#allocation2] sm:$0x1] %v24_v0 }
   0x3   :  { %2069 = sst [smem:[#allocation8_spill]] %s2045_s2 }
   0x4   :  { %2070 = sst [smem:[#allocation9_spill]] %s2046_s3 }
   0x5   :  { %26 = vsyncpa [#allocation4], 0  ;;  %s1613_s20 = smov [#allocation3]  }
   0x6   :  { %s42_s21 = sshll.u32 %s1613_s20, 4  ;;  %s43_s21 = int_to_ptr.vmem [resolvable:$true] %s42_s21 }
   0x7   :  { %s1599_s1 = scalar_lea.vmem %s43_s21, 256  ;;  %p1604_p1 = scmp.lt.s32.totalorder %s43_s21, %s43_s21 }
   0x8   :  { %p1600_p0 = scmp.ne.s32.totalorder %s43_s21, %s1599_s1  ;;  %p1605_p2 = scmp.lt.s32.totalorder %s1599_s1, %s1599_s1 }
   0xa   :  { %p1606_p3 = por %p1605_p2, %p1604_p1 }
   0xc   :  { %p1607_p4 = pnand %p1606_p3, %p1600_p0 }
   0xe   :  { %1610 = shalt.err (!%p1607_p4)
}
   0xf   :  { %s1614_s22 = smov 128   ;;  %s1615_s2 = smov 8  }
  0x10   :  { %48 = dma.hbm_to_vmem [thread:$0]  %s2048_s5, 256, %s43_s21, [#allocation4], %s1614_s22, %s1614_s22, %s1615_s2  }
  0x11   :  { %1611 = dma.done.wait [#allocation4], 256  }
  0x12   :  { %1612 = vsyncadd [#allocation4], 4294967040  ;;  %v1616_v1 = vmov 0   ;;  %v1505_v2 = vld [vmem:[%s2049_s6 + $0x34] ss:$8 sps:$4 sm:$0xff]   ;;  %s2071_s2 = sld [smem:[#allocation6_spill]]  ;;  %v96_v17 = vlaneseq }
  0x13   :  { %182 = vmatprep.mubr.bf16.mxu0 %v1616_v1  ;;  %1503 = vset.pattern.permute.xlu1 %v1616_v1  ;;  %v1507_v3 = vld [vmem:[%s2049_s6 + $0x30] ss:$8 sps:$4 sm:$0xff]   ;;  %v1508_v4 = vld [vmem:[%s2049_s6 + $0x24] ss:$8 sps:$4 sm:$0xff]   ;;  %v1510_v5 = vld [vmem:[%s2049_s6 + $0x20] ss:$8 sps:$4 sm:$0xff]  }
  0x14   :  { %1504 = vset.pattern.permute.xlu0 %v1616_v1  ;;  %158 = vmatprep.subr.bf16.mxu0 %v1505_v2  ;;  %v1511_v6 = vld [vmem:[%s2049_s6 + $0x14] ss:$8 sps:$4 sm:$0xff]   ;;  %v1513_v7 = vld [vmem:[%s2049_s6 + $0x10] ss:$8 sps:$4 sm:$0xff]   ;;  %v1514_v9 = vld [vmem:[%s2049_s6 + $0x4] ss:$8 sps:$4 sm:$0xff]  }
  0x15   :  { %159 = vmatpush1.bf16.msra.mxu0 %v1507_v3  ;;  %s2072_s27 = sld [smem:[#allocation8_spill]]  ;;  %v1516_v13 = vld [vmem:[%s2049_s6] ss:$8 sps:$4 sm:$0xff]   ;;  %vm146_vm0 = vcmask 523264   ;;  %v1777_v18 = vshrl.u32 %v96_v17, 7  ;;  %v1617_v19 = vmov 0.0  }
  0x16   :  { %160 = vmatprep.subr.bf16.mxu0 %v1508_v4  ;;  %1363 = vmatprep.subr.bf16.mxu1 %v1617_v19  ;;  %v94_v21 = vld [vmem:[%s2050_s7] sm:$0x3]  ;;  %vm1618_vm1 = vmmov 0   ;;  %s1619_s7 = smov 32   ;;  %s1620_s20 = smov 96   ;;  %vm198_vm2 = vcmask 261120  }
  0x17   :  { %v98_v20 = vsub.s32 0, %v1777_v18  ;;  %v102_v24 = vsub.s32 1, %v1777_v18  ;;  %1365 = vmatprep.mubr.msk.bf16.mxu1 %vm1618_vm1, %v1617_v19  ;;  %s1621_s21 = smov 16   ;;  %s1622_s1 = smov 112   ;;  %vm246_vm3 = vcmask 130048   ;;  %vm583_vm4 = vcmask 785408  }
  0x18   :  { %v79_v8 = vld [vmem:[%s2071_s2] sm:$0xff]  ;;  %v80_v10 = vld [vmem:[%s2071_s2 + $0x8] sm:$0xff]  ;;  %s1623_s22 = smov 80   ;;  %s1624_s2 = smov 64   ;;  %vm586_vm5 = vcmask 916480   ;;  %vm1256_vm6 = vcmask 7168  }
  0x19   :  { %161 = vmatpush1.bf16.msra.mxu0 %v1510_v5  ;;  %v99_v23 = vrot.slane %v94_v21, %v98_v20  ;;  %v103_v28 = vrot.slane %v94_v21, %v102_v24  ;;  %s2073_s24 = sld [smem:[#allocation9_spill]] }
  0x1a   :  { %162 = vmatprep.subr.bf16.mxu0 %v1511_v6 }
  0x1b   :  { %v81_v11 = vld [vmem:[%s2072_s27] sm:$0xff]  ;;  %v82_v12 = vld [vmem:[%s2072_s27 + $0x8] sm:$0xff] }
  0x1c   :  { %v1770_v14 = vmul.f32 %v81_v11, %v79_v8  ;;  %v1772_v15 = vmul.f32 %v82_v12, %v80_v10 }
  0x1d   :  { %163 = vmatpush1.bf16.msra.mxu0 %v1513_v7 }
  0x1e   :  { %164 = vmatprep.subr.bf16.mxu0 %v1514_v9  ;;  %v85_v16 = vpack.c.bf16 %v1772_v15, %v1770_v14 }
  0x21   :  { %165 = vmatpush1.bf16.msra.mxu0 %v1516_v13 }
  0x22   :  { %1375 = vmatprep.subr.bf16.mxu0 %v1617_v19 }
  0x24   :  { %1272 = vmatmul.mubr.msk.bf16.vlgmr.msra.gmra.mxu0 %vm146_vm0, %v85_v16 }
  0x25   :  { %1377 = vmatprep.mubr.msk.bf16.mxu0 %vm1618_vm1, %v1617_v19 }
  0xe4   :  { %v184_v22 = vpop.f32.mrf.mxu0 }
  0xe5   :  { %v185_v27 = vadd.f32 %v184_v22, %v99_v23 }
  0xe6   :  { %v186_v25 = vpop.f32.mrf.mxu0 }
  0xe7   :  { %v187_v33 = vadd.f32 %v186_v25, %v103_v28 }
  0xe8   :  { %v188_v26 = vpop.f32.mrf.mxu0 }
  0xe9   :  { %v189_v29 = vadd.f32 %v188_v26, %v99_v23 }
  0xea   :  { %v190_v30 = vpop.f32.mrf.mxu0 }
  0xeb   :  { %v1794_v31 = vpack.c.bf16 %v189_v29, %v185_v27  ;;  %v191_v32 = vadd.f32 %v190_v30, %v103_v28 }
  0xed   :  { %317 = vrot.lane.b32.xlu1 %v1794_v31, %s1619_s7  ;;  %196 = vrot.lane.b32.xlu0 %v1794_v31, %s1620_s20  ;;  %v1799_v34 = vpack.c.bf16 %v191_v32, %v187_v33 }
  0xf1   :  { %438 = vrot.lane.b32.xlu1 %v1799_v34, %s1620_s20  ;;  %319 = vrot.lane.b32.xlu0 %v1794_v31, %s1621_s21 }
  0xf5   :  { %436 = vrot.lane.b32.xlu0 %v1799_v34, %s1622_s1 }
 0x15f   :  { %v197_v35 = vpop.permute.xlu0 %196  ;;  %v318_v37 = vpop.permute.xlu1 %317 }
 0x160   :  { %v203_v36 = vsel %vm198_vm2, %v197_v35, 0 }
 0x161   :  { %1364 = vmatpush3.bf16.xpose.msra.mxu1 %v203_v36 }
 0x162   :  { %1369 = vmatprep.subr.bf16.mxu1 %v1617_v19 }
 0x163   :  { %v320_v38 = vpop.permute.xlu0 %319  ;;  %v439_v40 = vpop.permute.xlu1 %438 }
 0x164   :  { %v325_v39 = vsel %vm246_vm3, %v320_v38, 0  ;;  %v444_v41 = vsel %vm246_vm3, %v439_v40, 0 }
 0x165   :  { %1376 = vmatpush3.bf16.xpose.msra.mxu0 %v325_v39 }
 0x166   :  { %1387 = vmatprep.subr.bf16.mxu0 %v1617_v19 }
 0x167   :  { %v437_v42 = vpop.permute.xlu0 %436 }
 0x168   :  { %1366 = vmatmul.mubr.msk.bf16.vlgmr.msra.gmra.mxu1 %vm198_vm2, %v1794_v31 }
 0x169   :  { %1371 = vmatprep.mubr.msk.bf16.mxu1 %vm1618_vm1, %v1617_v19 }
 0x16c   :  { %1378 = vmatmul.mubr.msk.bf16.vlgmr.msra.gmra.mxu0 %vm246_vm3, %v318_v37 }
 0x16d   :  { %1388 = vmatpush3.bf16.xpose.msra.mxu0 %v444_v41  ;;  %1389 = vmatprep.mubr.msk.bf16.mxu0 %vm1618_vm1, %v1617_v19 }
 0x16e   :  { %1399 = vmatprep.subr.bf16.mxu0 %v1617_v19 }
 0x174   :  { %1390 = vmatmul.mubr.msk.bf16.vlgmr.msra.gmra.mxu0 %vm246_vm3, %v437_v42 }
 0x175   :  { %1415 = vmatprep.mubr.msk.bf16.mxu0 %vm1618_vm1, %v1617_v19 }
 0x228   :  { %v239_v43 = vpop.f32.mrf.mxu1 }
 0x229   :  { %v247_v44 = vsel %vm246_vm3, %v239_v43, -inf }
 0x22a   :  { %248 = vmax.xlane.f32.xlu1 %v247_v44  ;;  %v1367_v45 = vpop.f32.mrf.mxu1 }
 0x22c   :  { %v242_v46 = vpop.f32.mrf.mxu1  ;;  %v361_v47 = vpop.f32.mrf.mxu0 }
 0x22d   :  { %v250_v48 = vsel %vm246_vm3, %v242_v46, -inf  ;;  %v368_v52 = vsel %vm246_vm3, %v361_v47, -inf }
 0x22e   :  { %251 = vmax.xlane.f32.xlu0 %v250_v48  ;;  %v1368_v49 = vpop.f32.mrf.mxu1  ;;  %v1379_v50 = vpop.f32.mrf.mxu0 }
 0x230   :  { %v364_v51 = vpop.f32.mrf.mxu0 }
 0x231   :  { %v371_v53 = vsel %vm246_vm3, %v364_v51, -inf }
 0x232   :  { %369 = vmax.xlane.f32.xlu0 %v368_v52  ;;  %372 = vmax.xlane.f32.xlu1 %v371_v53  ;;  %v1380_v54 = vpop.f32.mrf.mxu0 }
 0x234   :  { %v480_v55 = vpop.f32.mrf.mxu0 }
 0x235   :  { %v487_v56 = vsel %vm246_vm3, %v480_v55, -inf }
 0x236   :  { %488 = vmax.xlane.f32.xlu0 %v487_v56  ;;  %v1391_v57 = vpop.f32.mrf.mxu0 }
 0x237   :  { %v1517_v57 = vld [vmem:[%s2051_s8 + $0x38] sm:$0xff]  }
 0x238   :  { %v483_v58 = vpop.f32.mrf.mxu0  ;;  %1400 = vmatpush3.bf16.msra.mxu0 %v1517_v57 }
 0x239   :  { %v490_v59 = vsel %vm246_vm3, %v483_v58, -inf  ;;  %1401 = vmatprep.subr.bf16.mxu0 %v1617_v19 }
 0x23a   :  { %491 = vmax.xlane.f32.xlu1 %v490_v59  ;;  %v1392_v60 = vpop.f32.mrf.mxu0  ;;  %v1519_v59 = vld [vmem:[%s2051_s8 + $0x28] sm:$0xff]  }
 0x23b   :  { %v1521_v60 = vld [vmem:[%s2051_s8 + $0x18] sm:$0xff]  }
 0x2b3   :  { %v249_v61 = vpop.xlane.xlu1 %248 }
 0x2b4   :  { %v253_v62 = vsub.f32 %v239_v43, %v249_v61 }
 0x2b6   :  { %v255_v63 = vmul.f32 1.442695, %v253_v62 }
 0x2b7   :  { %v252_v0 = vpop.xlane.xlu0 %251 }
 0x2b8   :  { %1551 = vpow2.f32 %v255_v63  ;;  %v254_v2 = vsub.f32 %v242_v46, %v252_v0  ;;  %v1522_v63 = vld [vmem:[%s2051_s8 + $0x10] sm:$0xff]  }
 0x2ba   :  { %v257_v3 = vmul.f32 1.442695, %v254_v2 }
 0x2bb   :  { %v373_v4 = vpop.xlane.xlu1 %372  ;;  %v370_v5 = vpop.xlane.xlu0 %369 }
 0x2bc   :  { %1553 = vpow2.f32 %v257_v3  ;;  %v375_v6 = vsub.f32 %v364_v51, %v373_v4  ;;  %v374_v7 = vsub.f32 %v361_v47, %v370_v5  ;;  %v1523_v3 = vld [vmem:[%s2051_s8 + $0x8] sm:$0xff]  }
 0x2be   :  { %v378_v8 = vmul.f32 1.442695, %v375_v6  ;;  %v376_v9 = vmul.f32 1.442695, %v374_v7  ;;  %v1524_v7 = vld [vmem:[%s2051_s8] sm:$0xff]  }
 0x2bf   :  { %v489_v10 = vpop.xlane.xlu0 %488 }
 0x2c0   :  { %1555 = vpow2.f32 %v378_v8  ;;  %v493_v11 = vsub.f32 %v480_v55, %v489_v10 }
 0x2c1   :  { %1557 = vpow2.f32 %v376_v9 }
 0x2c2   :  { %v495_v12 = vmul.f32 1.442695, %v493_v11  ;;  %v1525_v11 = vld [vmem:[%s2053_s10 + $0x30] ss:$8 sps:$4 sm:$0xff]  }
 0x2c3   :  { %v492_v13 = vpop.xlane.xlu1 %491 }
 0x2c4   :  { %1559 = vpow2.f32 %v495_v12  ;;  %v494_v16 = vsub.f32 %v483_v58, %v492_v13  ;;  %v1518_v58 = vld [vmem:[%s2051_s8 + $0x30] sm:$0xff]  }
 0x2c5   :  { %v1552_v17 = vpop.eup %1551  ;;  %1402 = vmatpush3.bf16.msra.mxu0 %v1518_v58  ;;  %v1527_v12 = vld [vmem:[%s2053_s10 + $0x34] ss:$8 sps:$4 sm:$0xff]   ;;  %v717_v58 = vld [vmem:[%s2054_s11] sm:$0x3] }
 0x2c6   :  { %v497_v21 = vmul.f32 1.442695, %v494_v16  ;;  %v259_v22 = vsel %vm246_vm3, %v1552_v17, 0.0  ;;  %1403 = vmatprep.subr.bf16.mxu0 %v1617_v19 }
 0x2c7   :  { %260 = vadd.xlane.f32.xlu0 %v259_v22 }
 0x2c8   :  { %1561 = vpow2.f32 %v497_v21 }
 0x2c9   :  { %v1554_v23 = vpop.eup %1553  ;;  %1404 = vmatpush3.bf16.msra.mxu0 %v1519_v59 }
 0x2ca   :  { %v262_v25 = vsel %vm246_vm3, %v1554_v23, 0.0  ;;  %1405 = vmatprep.subr.bf16.mxu0 %v1617_v19 }
 0x2cb   :  { %263 = vadd.xlane.f32.xlu1 %v262_v25 }
 0x2cd   :  { %v1556_v26 = vpop.eup %1555 }
 0x2ce   :  { %v1558_v27 = vpop.eup %1557  ;;  %v383_v28 = vsel %vm246_vm3, %v1556_v26, 0.0 }
 0x2cf   :  { %384 = vadd.xlane.f32.xlu1 %v383_v28  ;;  %v380_v29 = vsel %vm246_vm3, %v1558_v27, 0.0 }
 0x2d0   :  { %381 = vadd.xlane.f32.xlu0 %v380_v29 }
 0x2d1   :  { %v1560_v30 = vpop.eup %1559 }
 0x2d2   :  { %v499_v32 = vsel %vm246_vm3, %v1560_v30, 0.0 }
 0x2d4   :  { %500 = vadd.xlane.f32.xlu0 %v499_v32 }
 0x2d5   :  { %v1562_v33 = vpop.eup %1561 }
 0x2d6   :  { %v502_v35 = vsel %vm246_vm3, %v1562_v33, 0.0 }
 0x2d7   :  { %503 = vadd.xlane.f32.xlu1 %v502_v35 }
 0x2e8   :  { %510 = vrot.lane.b32.xlu1 %v1799_v34, %s1623_s22 }
 0x2ea   :  { %270 = vrot.lane.b32.xlu0 %v1794_v31, %s1624_s2 }
 0x350   :  { %v261_v36 = vpop.xlane.xlu0 %260 }
 0x351   :  { %1563 = vrcp.f32 %v261_v36 }
 0x354   :  { %v264_v37 = vpop.xlane.xlu1 %263 }
 0x355   :  { %1565 = vrcp.f32 %v264_v37 }
 0x358   :  { %v385_v38 = vpop.xlane.xlu1 %384 }
 0x359   :  { %1567 = vrcp.f32 %v385_v38  ;;  %v382_v39 = vpop.xlane.xlu0 %381 }
 0x35a   :  { %1569 = vrcp.f32 %v382_v39 }
 0x35d   :  { %v501_v40 = vpop.xlane.xlu0 %500 }
 0x35e   :  { %v1564_v41 = vpop.eup %1563 }
 0x35f   :  { %v266_v45 = vmul.f32 %v1564_v41, %v1552_v17 }
 0x360   :  { %v504_v42 = vpop.xlane.xlu1 %503 }
 0x361   :  { %1571 = vrcp.f32 %v504_v42  ;;  %v271_v43 = vpop.permute.xlu0 %270  ;;  %v1530_v42 = vld [vmem:[%s2053_s10 + $0x24] ss:$8 sps:$4 sm:$0xff]  }
 0x362   :  { %v1566_v44 = vpop.eup %1565  ;;  %1370 = vmatpush3.bf16.msra.mxu1 %v271_v43  ;;  %1573 = vrcp.f32 %v501_v40  ;;  %v1531_v43 = vld [vmem:[%s2053_s10 + $0x10] ss:$8 sps:$4 sm:$0xff]  }
 0x363   :  { %1381 = vmatprep.subr.bf16.mxu1 %v1617_v19  ;;  %v268_v31 = vmul.f32 %v1566_v44, %v1554_v23  ;;  %v1536_v44 = vld [vmem:[%s2053_s10 + $0x4] ss:$8 sps:$4 sm:$0xff]  }
 0x364   :  { %v511_v53 = vpop.permute.xlu1 %510 }
 0x365   :  { %v269_v46 = vpack.c.bf16 %v268_v31, %v266_v45  ;;  %v1534_v45 = vld [vmem:[%s2053_s10] ss:$8 sps:$4 sm:$0xff]  }
 0x366   :  { %v1568_v47 = vpop.eup %1567  ;;  %v1279_v31 = vld [vmem:[%s2052_s9] ss:$0 sm:$0xff] }
 0x367   :  { %v1570_v48 = vpop.eup %1569  ;;  %1372 = vmatmul.mubr.msk.bf16.vlgmr.msra.gmra.mxu1 %vm246_vm3, %v269_v46  ;;  %v389_v50 = vmul.f32 %v1568_v47, %v1556_v26 }
 0x368   :  { %1382 = vmatpush3.bf16.msra.mxu1 %v1799_v34  ;;  %1383 = vmatprep.mubr.msk.bf16.mxu1 %vm1618_vm1, %v1617_v19  ;;  %v387_v49 = vmul.f32 %v1570_v48, %v1558_v27 }
 0x369   :  { %1393 = vmatprep.subr.bf16.mxu1 %v1617_v19 }
 0x36a   :  { %v390_v51 = vpack.c.bf16 %v389_v50, %v387_v49 }
 0x36e   :  { %v1572_v52 = vpop.eup %1571 }
 0x36f   :  { %1384 = vmatmul.mubr.msk.bf16.vlgmr.msra.gmra.mxu1 %vm246_vm3, %v390_v51  ;;  %v1574_v54 = vpop.eup %1573  ;;  %v508_v55 = vmul.f32 %v1572_v52, %v1562_v33  ;;  %v704_v52 = vld [vmem:[%s2073_s24] sm:$0xff] }
 0x370   :  { %1394 = vmatpush3.bf16.msra.mxu1 %v511_v53  ;;  %1395 = vmatprep.mubr.msk.bf16.mxu1 %vm1618_vm1, %v1617_v19  ;;  %v506_v56 = vmul.f32 %v1574_v54, %v1560_v30  ;;  %v705_v53 = vld [vmem:[%s2073_s24 + $0x8] sm:$0xff] }
 0x371   :  { %780 = vmatprep.subr.bf16.mxu1 %v1527_v12 }
 0x372   :  { %v509_v34 = vpack.c.bf16 %v508_v55, %v506_v56 }
 0x377   :  { %1396 = vmatmul.mubr.msk.bf16.vlgmr.msra.gmra.mxu1 %vm246_vm3, %v509_v34 }
 0x378   :  { %804 = vmatprep.mubr.bf16.mxu1 %v1616_v1  ;;  %v1520_v1 = vld [vmem:[%s2051_s8 + $0x20] sm:$0xff]   ;;  %781 = vmatpush1.bf16.msra.mxu1 %v1525_v11 }
 0x379   :  { %1406 = vmatpush3.bf16.msra.mxu0 %v1520_v1  ;;  %782 = vmatprep.subr.bf16.mxu1 %v1530_v42  ;;  %v722_v1 = vrot.slane %v717_v58, %v98_v20  ;;  %v1542_v42 = vld [vmem:[%s2055_s12 + $0x10] sm:$0xff]  }
 0x37a   :  { %1407 = vmatprep.subr.bf16.mxu0 %v1617_v19 }
 0x37d   :  { %1408 = vmatpush3.bf16.msra.mxu0 %v1521_v60 }
 0x37e   :  { %1409 = vmatprep.subr.bf16.mxu0 %v1617_v19 }
 0x381   :  { %1410 = vmatpush3.bf16.msra.mxu0 %v1522_v63 }
 0x382   :  { %1411 = vmatprep.subr.bf16.mxu0 %v1617_v19 }
 0x385   :  { %1412 = vmatpush3.bf16.msra.mxu0 %v1523_v3 }
 0x386   :  { %1413 = vmatprep.subr.bf16.mxu0 %v1617_v19 }
 0x389   :  { %1414 = vmatpush3.bf16.msra.mxu0 %v1524_v7 }
 0x38a   :  { %1431 = vmatprep.subr.bf16.mxu0 %v1617_v19 }
 0x427   :  { %v310_v61 = vpop.f32.mrf.mxu1 }
 0x429   :  { %v1373_v62 = vpop.f32.mrf.mxu1 }
 0x42b   :  { %v313_v0 = vpop.f32.mrf.mxu1 }
 0x42c   :  { %v1483_v2 = vpack.i.bf16 %v313_v0, %v310_v61 }
 0x42d   :  { %v1374_v4 = vpop.f32.mrf.mxu1 }
 0x42e   :  { %1484 = vrot.lane.b32.xlu1 %v1483_v2, %s1624_s2 }
 0x42f   :  { %v428_v5 = vpop.f32.mrf.mxu1 }
 0x431   :  { %v1385_v6 = vpop.f32.mrf.mxu1 }
 0x433   :  { %v431_v8 = vpop.f32.mrf.mxu1 }
 0x434   :  { %v1488_v9 = vpack.i.bf16 %v431_v8, %v428_v5  ;;  %v726_v5 = vrot.slane %v717_v58, %v102_v24  ;;  %v1299_v58 = vld [vmem:[%s2056_s13] ss:$0 sm:$0xff] }
 0x435   :  { %v1386_v10 = vpop.f32.mrf.mxu1 }
 0x436   :  { %1489 = vrot.lane.b32.xlu0 %v1488_v9, %s1620_s20  ;;  %s2074_s20 = sld [smem:[#allocation7_spill]] }
 0x437   :  { %v550_v13 = vpop.f32.mrf.mxu1 }
 0x439   :  { %v1397_v16 = vpop.f32.mrf.mxu1 }
 0x43b   :  { %v553_v17 = vpop.f32.mrf.mxu1 }
 0x43c   :  { %v1493_v21 = vpack.i.bf16 %v553_v17, %v550_v13 }
 0x43d   :  { %v1398_v22 = vpop.f32.mrf.mxu1 }
 0x43e   :  { %1494 = vrot.lane.b32.xlu1 %v1493_v21, %s1622_s1 }
 0x4a0   :  { %v1485_v23 = vpop.permute.xlu1 %1484 }
 0x4a1   :  { %v1487_v26 = vunpack.i.h.bf16 %v1485_v23  ;;  %v1486_v27 = vunpack.i.l.bf16 %v1485_v23 }
 0x4a3   :  { %v582_v32 = vsel %vm146_vm0, %v1772_v15, %v1487_v26  ;;  %v581_v33 = vsel %vm146_vm0, %v1770_v14, %v1486_v27  ;;  %v1528_v15 = vld [vmem:[%s2053_s10 + $0x20] ss:$8 sps:$4 sm:$0xff]   ;;  %v1533_v14 = vld [vmem:[%s2053_s10 + $0x14] ss:$8 sps:$4 sm:$0xff]  }
 0x4a4   :  { %783 = vmatpush1.bf16.msra.mxu1 %v1528_v15  ;;  %v1543_v15 = vld [vmem:[%s2055_s12 + $0x8] sm:$0xff]  }
 0x4a5   :  { %784 = vmatprep.subr.bf16.mxu1 %v1533_v14  ;;  %v1544_v14 = vld [vmem:[%s2055_s12] sm:$0xff]  }
 0x4a8   :  { %v1490_v25 = vpop.permute.xlu0 %1489  ;;  %785 = vmatpush1.bf16.msra.mxu1 %v1531_v43  ;;  %v1545_v43 = vld [vmem:[%s2057_s14 + $0x18] sm:$0xff]  }
 0x4a9   :  { %v1492_v28 = vunpack.i.h.bf16 %v1490_v25  ;;  %v1491_v29 = vunpack.i.l.bf16 %v1490_v25  ;;  %786 = vmatprep.subr.bf16.mxu1 %v1536_v44 }
 0x4ab   :  { %v585_v37 = vsel %vm583_vm4, %v582_v32, %v1492_v28  ;;  %v584_v38 = vsel %vm583_vm4, %v581_v33, %v1491_v29 }
 0x4ac   :  { %787 = vmatpush1.bf16.msra.mxu1 %v1534_v45 }
 0x4ad   :  { %1419 = vmatprep.subr.bf16.mxu1 %v1617_v19 }
 0x4b0   :  { %v1495_v30 = vpop.permute.xlu1 %1494 }
 0x4b1   :  { %v1497_v35 = vunpack.i.h.bf16 %v1495_v30  ;;  %v1496_v36 = vunpack.i.l.bf16 %v1495_v30 }
 0x4b3   :  { %v588_v39 = vsel %vm586_vm5, %v585_v37, %v1497_v35  ;;  %v587_v40 = vsel %vm586_vm5, %v584_v38, %v1496_v36  ;;  %v1537_v37 = vld [vmem:[%s2055_s12 + $0x38] sm:$0xff]   ;;  %v1538_v38 = vld [vmem:[%s2055_s12 + $0x30] sm:$0xff]  }
 0x4b4   :  { %v589_v41 = vpack.c.bf16 %v588_v39, %v587_v40  ;;  %v1539_v39 = vld [vmem:[%s2055_s12 + $0x28] sm:$0xff]   ;;  %v1540_v40 = vld [vmem:[%s2055_s12 + $0x20] sm:$0xff]  }
 0x4b6   :  { %1416 = vmatmul.mubr.bf16.vlgmr.msra.gmra.mxu0 %v589_v41  ;;  %v1541_v41 = vld [vmem:[%s2055_s12 + $0x18] sm:$0xff]  }
 0x4b7   :  { %1447 = vmatprep.mubr.msk.bf16.mxu0 %vm1618_vm1, %v1617_v19  ;;  %1432 = vmatpush3.bf16.msra.mxu0 %v1537_v37 }
 0x4b8   :  { %1433 = vmatprep.subr.bf16.mxu0 %v1617_v19 }
 0x4bb   :  { %1434 = vmatpush3.bf16.msra.mxu0 %v1538_v38 }
 0x4bc   :  { %1435 = vmatprep.subr.bf16.mxu0 %v1617_v19 }
 0x4bf   :  { %1436 = vmatpush3.bf16.msra.mxu0 %v1539_v39 }
 0x4c0   :  { %1437 = vmatprep.subr.bf16.mxu0 %v1617_v19 }
 0x4c3   :  { %1438 = vmatpush3.bf16.msra.mxu0 %v1540_v40 }
 0x4c4   :  { %1439 = vmatprep.subr.bf16.mxu0 %v1617_v19 }
 0x4c7   :  { %1440 = vmatpush3.bf16.msra.mxu0 %v1541_v41 }
 0x4c8   :  { %1441 = vmatprep.subr.bf16.mxu0 %v1617_v19 }
 0x4cb   :  { %1442 = vmatpush3.bf16.msra.mxu0 %v1542_v42 }
 0x4cc   :  { %1443 = vmatprep.subr.bf16.mxu0 %v1617_v19 }
 0x4cf   :  { %1444 = vmatpush3.bf16.msra.mxu0 %v1543_v15 }
 0x4d0   :  { %1445 = vmatprep.subr.bf16.mxu0 %v1617_v19 }
 0x4d3   :  { %1446 = vmatpush3.bf16.msra.mxu0 %v1544_v14 }
 0x576   :  { %v695_v46 = vpop.f32.mrf.mxu0 }
 0x577   :  { %v696_v47 = vadd.f32 %v1279_v31, %v695_v46 }
 0x578   :  { %v1417_v48 = vpop.f32.mrf.mxu0 }
 0x579   :  { %v702_v50 = vmax.f32 %v696_v47, 0.0 }
 0x57a   :  { %v698_v49 = vpop.f32.mrf.mxu0 }
 0x57b   :  { %v699_v51 = vadd.f32 %v1279_v31, %v698_v49  ;;  %v1923_v56 = vmul.f32 %v704_v52, %v702_v50 }
 0x57c   :  { %v1418_v54 = vpop.f32.mrf.mxu0 }
 0x57d   :  { %v703_v55 = vmax.f32 %v699_v51, 0.0  ;;  %v1546_v54 = vld [vmem:[%s2057_s14 + $0x10] sm:$0xff]  }
 0x57f   :  { %v1925_v34 = vmul.f32 %v705_v53, %v703_v55  ;;  %v1547_v55 = vld [vmem:[%s2057_s14 + $0x8] sm:$0xff]  }
 0x581   :  { %v708_v57 = vpack.c.bf16 %v1925_v34, %v1923_v56 }
 0x583   :  { %1296 = vmatmul.mubr.msk.bf16.vlgmr.msra.gmra.mxu1 %vm146_vm0, %v708_v57  ;;  %v1073_v57 = vld [vmem:[%s2074_s20 + $0x8] sm:$0xff] }
 0x584   :  { %1421 = vmatprep.mubr.msk.bf16.mxu1 %vm1618_vm1, %v1617_v19 }
 0x643   :  { %v806_v59 = vpop.f32.mrf.mxu1 }
 0x644   :  { %v807_v62 = vadd.f32 %v806_v59, %v722_v1 }
 0x645   :  { %v808_v60 = vpop.f32.mrf.mxu1 }
 0x646   :  { %v809_v7 = vadd.f32 %v808_v60, %v726_v5 }
 0x647   :  { %v810_v61 = vpop.f32.mrf.mxu1 }
 0x648   :  { %v811_v63 = vadd.f32 %v810_v61, %v722_v1 }
 0x649   :  { %v812_v3 = vpop.f32.mrf.mxu1 }
 0x64a   :  { %v815_v0 = vpack.c.bf16 %v811_v63, %v807_v62  ;;  %v813_v6 = vadd.f32 %v812_v3, %v726_v5 }
 0x64c   :  { %818 = vrot.lane.b32.xlu0 %v815_v0, %s1624_s2  ;;  %v816_v20 = vpack.c.bf16 %v813_v6, %v809_v7 }
 0x6be   :  { %v819_v2 = vpop.permute.xlu0 %818 }
 0x6bf   :  { %v824_v4 = vsel %vm146_vm0, %v819_v2, 0  ;;  %v1060_v2 = vld [vmem:[%s2047_s4 + $0x8] sm:$0xff] }
 0x6c0   :  { %1420 = vmatpush3.bf16.xpose.msra.mxu1 %v824_v4 }
 0x6c1   :  { %1425 = vmatprep.subr.bf16.mxu1 %v1617_v19 }
 0x6c7   :  { %1422 = vmatmul.mubr.msk.bf16.vlgmr.msra.gmra.mxu1 %vm146_vm0, %v815_v0  ;;  %v1059_v0 = vld [vmem:[%s2047_s4] sm:$0xff] }
 0x6c8   :  { %1426 = vmatpush3.bf16.msra.mxu1 %v816_v20  ;;  %1427 = vmatprep.mubr.msk.bf16.mxu1 %vm1618_vm1, %v1617_v19  ;;  %v1549_v20 = vld [vmem:[%s2060_s17 + $0x8] sm:$0xff]  }
 0x6c9   :  { %1451 = vmatprep.subr.bf16.mxu1 %v1617_v19 }
 0x787   :  { %v860_v8 = vpop.f32.mrf.mxu1 }
 0x788   :  { %v867_v9 = vsel %vm246_vm3, %v860_v8, -inf }
 0x789   :  { %868 = vmax.xlane.f32.xlu1 %v867_v9  ;;  %v1423_v18 = vpop.f32.mrf.mxu1  ;;  %v1308_v9 = vld [vmem:[%s2058_s15] ss:$0 sm:$0xff] }
 0x78b   :  { %v863_v24 = vpop.f32.mrf.mxu1 }
 0x78c   :  { %v870_v10 = vsel %vm246_vm3, %v863_v24, -inf }
 0x78d   :  { %871 = vmax.xlane.f32.xlu0 %v870_v10  ;;  %v1424_v11 = vpop.f32.mrf.mxu1 }
 0x812   :  { %v869_v12 = vpop.xlane.xlu1 %868 }
 0x813   :  { %v873_v13 = vsub.f32 %v860_v8, %v869_v12  ;;  %v1550_v8 = vld [vmem:[%s2060_s17] sm:$0xff]  }
 0x814   :  { %v1314_v12 = vld [vmem:[%s2059_s16] ss:$0 sm:$0xff] }
 0x815   :  { %v875_v16 = vmul.f32 1.442695, %v873_v13 }
 0x816   :  { %v872_v17 = vpop.xlane.xlu0 %871 }
 0x817   :  { %1575 = vpow2.f32 %v875_v16  ;;  %v874_v21 = vsub.f32 %v863_v24, %v872_v17 }
 0x819   :  { %v877_v22 = vmul.f32 1.442695, %v874_v21  ;;  %v1170_v21 = vld [vmem:[#allocation3] sm:$0xff] }
 0x81b   :  { %1577 = vpow2.f32 %v877_v22 }
 0x824   :  { %v1576_v23 = vpop.eup %1575 }
 0x825   :  { %v879_v25 = vsel %vm246_vm3, %v1576_v23, 0.0 }
 0x826   :  { %880 = vadd.xlane.f32.xlu0 %v879_v25  ;;  %v1171_v25 = vld [vmem:[#allocation3 + $0x8] sm:$0xff] }
 0x828   :  { %v1578_v26 = vpop.eup %1577 }
 0x829   :  { %v882_v27 = vsel %vm246_vm3, %v1578_v26, 0.0 }
 0x82a   :  { %883 = vadd.xlane.f32.xlu1 %v882_v27 }
 0x8af   :  { %v881_v28 = vpop.xlane.xlu0 %880 }
 0x8b0   :  { %1579 = vrcp.f32 %v881_v28 }
 0x8b3   :  { %v884_v29 = vpop.xlane.xlu1 %883 }
 0x8b4   :  { %1581 = vrcp.f32 %v884_v29 }
 0x8bd   :  { %v1580_v30 = vpop.eup %1579 }
 0x8be   :  { %v886_v33 = vmul.f32 %v1580_v30, %v1576_v23 }
 0x8c1   :  { %v1582_v32 = vpop.eup %1581 }
 0x8c2   :  { %v888_v35 = vmul.f32 %v1582_v32, %v1578_v26 }
 0x8c4   :  { %v889_v36 = vpack.c.bf16 %v888_v35, %v886_v33  ;;  %v1315_v35 = vld [vmem:[#allocation2] ss:$0 sm:$0xff] }
 0x8c6   :  { %1428 = vmatmul.mubr.msk.bf16.vlgmr.msra.gmra.mxu1 %vm246_vm3, %v889_v36 }
 0x8c7   :  { %1459 = vmatprep.mubr.msk.bf16.mxu1 %vm1618_vm1, %v1617_v19  ;;  %1452 = vmatpush3.bf16.msra.mxu1 %v1545_v43 }
 0x8c8   :  { %1453 = vmatprep.subr.bf16.mxu1 %v1617_v19 }
 0x8cb   :  { %1454 = vmatpush3.bf16.msra.mxu1 %v1546_v54 }
 0x8cc   :  { %1455 = vmatprep.subr.bf16.mxu1 %v1617_v19 }
 0x8cf   :  { %1456 = vmatpush3.bf16.msra.mxu1 %v1547_v55 }
 0x8d0   :  { %1457 = vmatprep.subr.bf16.mxu1 %v1617_v19 }
 0x986   :  { %v927_v44 = vpop.f32.mrf.mxu1 }
 0x988   :  { %v1429_v45 = vpop.f32.mrf.mxu1 }
 0x98a   :  { %v930_v31 = vpop.f32.mrf.mxu1 }
 0x98b   :  { %v1498_v46 = vpack.i.bf16 %v930_v31, %v927_v44 }
 0x98c   :  { %v1430_v47 = vpop.f32.mrf.mxu1 }
 0x98d   :  { %1499 = vrot.lane.b32.xlu0 %v1498_v46, %s1624_s2 }
 0x9ff   :  { %v1500_v48 = vpop.permute.xlu0 %1499 }
 0xa00   :  { %v1502_v49 = vunpack.i.h.bf16 %v1500_v48  ;;  %v1501_v50 = vunpack.i.l.bf16 %v1500_v48 }
 0xa02   :  { %v943_v51 = vsel %vm146_vm0, %v1925_v34, %v1502_v49  ;;  %v942_v52 = vsel %vm146_vm0, %v1923_v56, %v1501_v50  ;;  %v1548_v56 = vld [vmem:[%s2057_s14] sm:$0xff]  }
 0xa03   :  { %v944_v53 = vpack.c.bf16 %v943_v51, %v942_v52  ;;  %1458 = vmatpush3.bf16.msra.mxu1 %v1548_v56  ;;  %v1072_v34 = vld [vmem:[%s2074_s20] sm:$0xff] }
 0xa04   :  { %1463 = vmatprep.subr.bf16.mxu1 %v1617_v19  ;;  %1077 = vperm.xlu1 %1503, %v1072_v34  }
 0xa05   :  { %1448 = vmatmul.mubr.bf16.vlgmr.msra.gmra.mxu0 %v944_v53 }
 0xa08   :  { %1082 = vperm.xlu1 %1503, %v1073_v57  }
 0xa7f   :  { %v1078_v18 = vpop.permute.xlu1 %1077 }
 0xa80   :  { %v1091_v24 = vmul.f32 %v1308_v9, %v1078_v18 }
 0xa83   :  { %v1083_v10 = vpop.permute.xlu1 %1082 }
 0xac5   :  { %v1050_v59 = vpop.f32.mrf.mxu0 }
 0xac6   :  { %v1051_v1 = vadd.f32 %v1299_v58, %v1050_v59 }
 0xac7   :  { %v1449_v60 = vpop.f32.mrf.mxu0 }
 0xac8   :  { %v1057_v62 = vmax.f32 %v1051_v1, 0.0 }
 0xac9   :  { %v1053_v61 = vpop.f32.mrf.mxu0 }
 0xaca   :  { %v1054_v63 = vadd.f32 %v1299_v58, %v1053_v61  ;;  %v1061_v5 = vmul.f32 %v1059_v0, %v1057_v62 }
 0xacb   :  { %v1450_v3 = vpop.f32.mrf.mxu0 }
 0xacc   :  { %v1058_v4 = vmax.f32 %v1054_v63, 0.0 }
 0xace   :  { %v1062_v6 = vmul.f32 %v1060_v2, %v1058_v4 }
 0xad0   :  { %v1063_v7 = vpack.c.bf16 %v1062_v6, %v1061_v5 }
 0xad2   :  { %1460 = vmatmul.mubr.msk.bf16.vlgmr.msra.gmra.mxu1 %vm146_vm0, %v1063_v7 }
 0xad3   :  { %1467 = vmatprep.mubr.msk.bf16.mxu1 %vm1618_vm1, %v1617_v19  ;;  %1464 = vmatpush3.bf16.msra.mxu1 %v1549_v20 }
 0xad4   :  { %1465 = vmatprep.subr.bf16.mxu1 %v1617_v19  ;;  %v1092_v19 = vmul.f32 %v1308_v9, %v1083_v10 }
 0xad7   :  { %1466 = vmatpush3.bf16.msra.mxu1 %v1550_v8 }
 0xb92   :  { %v1154_v11 = vpop.f32.mrf.mxu1 }
 0xb93   :  { %v1155_v13 = vadd.f32 %v1154_v11, %v1091_v24 }
 0xb94   :  { %v1461_v16 = vpop.f32.mrf.mxu1 }
 0xb95   :  { %v1168_v17 = vadd.f32 %v1314_v12, %v1155_v13 }
 0xb96   :  { %v1157_v22 = vpop.f32.mrf.mxu1 }
 0xb97   :  { %v1158_v23 = vadd.f32 %v1157_v22, %v1092_v19  ;;  %v1172_v27 = vmul.f32 %v1170_v21, %v1168_v17 }
 0xb98   :  { %v1462_v26 = vpop.f32.mrf.mxu1 }
 0xb99   :  { %v1169_v28 = vadd.f32 %v1314_v12, %v1158_v23  ;;  %v1174_v30 = vmax.f32 %v1172_v27, 0.0 }
 0xb9b   :  { %v1173_v29 = vmul.f32 %v1171_v25, %v1169_v28 }
 0xb9d   :  { %v1175_v32 = vmax.f32 %v1173_v29, 0.0 }
 0xb9f   :  { %v1176_v33 = vpack.c.bf16 %v1175_v32, %v1174_v30 }
 0xba1   :  { %1468 = vmatmul.mubr.msk.bf16.vlgmr.msra.gmra.mxu1 %vm198_vm2, %v1176_v33 }
 0xc61   :  { %v1237_v36 = vpop.f32.mrf.mxu1 }
 0xc62   :  { %v1238_v37 = vadd.f32 %v1315_v35, %v1237_v36 }
 0xc63   :  { %v1469_v38 = vpop.f32.mrf.mxu1 }
 0xc64   :  { %v1319_v39 = vmul.f32 -1.442695, %v1238_v37 }
 0xc65   :  { %v1240_v40 = vpop.f32.mrf.mxu1 }
 0xc66   :  { %1583 = vpow2.f32 %v1319_v39  ;;  %v1241_v41 = vadd.f32 %v1315_v35, %v1240_v40 }
 0xc67   :  { %v1470_v42 = vpop.f32.mrf.mxu1 }
 0xc68   :  { %v1320_v15 = vmul.f32 -1.442695, %v1241_v41 }
 0xc6a   :  { %1585 = vpow2.f32 %v1320_v15 }
 0xc73   :  { %v1584_v14 = vpop.eup %1583 }
 0xc74   :  { %v1250_v43 = vadd.f32 1.0, %v1584_v14 }
 0xc76   :  { %1587 = vrcp.f32 %v1250_v43 }
 0xc77   :  { %v1586_v44 = vpop.eup %1585 }
 0xc78   :  { %v1251_v45 = vadd.f32 1.0, %v1586_v44 }
 0xc7a   :  { %1589 = vrcp.f32 %v1251_v45 }
 0xc83   :  { %v1588_v31 = vpop.eup %1587 }
 0xc84   :  { %1257 = vst.msk [vmem:[%s2062_s19] sm:$0xff] %vm1256_vm6, %v1588_v31 }
 0xc87   :  { %v1590_v46 = vpop.eup %1589 }
 0xc88   :  { %1258 = vst.msk [vmem:[%s2062_s19 + $0x8] sm:$0xff] %vm1256_vm6, %v1590_v46 }
 0xc89   :  { %1263 = vsyncpa [#allocation4], 1 }

</bundles_post_ra>
